<compile_context>
chip_gen: v7x
topology: tpu7x:2x2x1
jax: 0.10.0
libtpu: 0.0.40
codegen_flags: <defaults>
</compile_context>

<pallas_src>
import jax
import jax.numpy as jnp
from jax.experimental import pallas as pl
from jax.experimental.pallas import tpu as pltpu

_LANE = 128       # vreg lane width
_MAX_TR = 1024    # rows per tile: 1024*128*4B = 512 KiB per f32 buffer


def _soft_kernel(tau_ref, z_ref, o_ref):
    # tau_ref: (1, 1) f32 scalar in SMEM; z_ref/o_ref: (TR, 128) tile in VMEM.
    tau = tau_ref[0, 0]
    z = z_ref[...].astype(jnp.float32)
    res = jnp.maximum(z - tau, 0.0) - jnp.maximum(-z - tau, 0.0)
    o_ref[...] = res.astype(o_ref.dtype)


def soft_act(z, tau):
    """Elementwise soft(z, tau) via a tiled, pipelined Pallas TPU kernel.

    z:   array of any shape (e.g. NCHW), any float dtype.
    tau: scalar (the learnable threshold parameter of SoftAct).
    """
    orig_shape = z.shape
    orig_dtype = z.dtype

    flat = z.reshape(-1)
    n = flat.shape[0]

    # Pad only when needed, and only up to the next multiple of 128 lanes.
    if n % _LANE != 0:
        padded = pl.cdiv(n, _LANE) * _LANE
        flat = jnp.pad(flat, (0, padded - n))
    else:
        padded = n
    rows = padded // _LANE
    z2d = flat.reshape(rows, _LANE)

    # Row-tile choice:
    #  - large inputs: fixed 1024-row tiles (multiple of 8, ~85% of HBM
    #    roofline for elementwise f32), ragged last block handled by Pallas.
    #  - small inputs: a single full-extent block (always legal, even when
    #    rows is not a multiple of 8).
    tr = _MAX_TR if rows >= _MAX_TR else rows
    grid = (pl.cdiv(rows, tr),)

    tau_arr = jnp.asarray(tau, dtype=jnp.float32).reshape(1, 1)

    itemsize = jnp.dtype(orig_dtype).itemsize
    cost = pl.CostEstimate(
        flops=3 * padded,
        transcendentals=0,
        bytes_accessed=2 * padded * itemsize,
    )

    out2d = pl.pallas_call(
        _soft_kernel,
        out_shape=jax.ShapeDtypeStruct((rows, _LANE), orig_dtype),
        grid=grid,
        in_specs=[
            pl.BlockSpec(memory_space=pltpu.SMEM),        # tau scalar
            pl.BlockSpec((tr, _LANE), lambda i: (i, 0)),  # z row-tile
        ],
        out_specs=pl.BlockSpec((tr, _LANE), lambda i: (i, 0)),
        compiler_params=pltpu.CompilerParams(
            dimension_semantics=("parallel",)),
        cost_estimate=cost,
    )(tau_arr, z2d)

    if padded != n:
        return out2d.reshape(-1)[:n].reshape(orig_shape)
    return out2d.reshape(orig_shape)


class SoftActPallas:
    """Mirror of the PyTorch SoftAct module (deterministic init)."""

    def __init__(self, in_features, tau=None):
        self.in_features = in_features
        # PyTorch: tau defaults to Parameter(torch.tensor(0.0))
        self.tau = jnp.float32(0.0) if tau is None else jnp.float32(tau)

    def __call__(self, z):
        return soft_act(z, self.tau)


def _ref(x, tau):
    return jnp.maximum(x - tau, 0.0) - jnp.maximum(-x - tau, 0.0)


if __name__ == "__main__":
    key = jax.random.PRNGKey(0)
    # Small NCHW input consistent with the module being used on conv features.
    x = jax.random.normal(key, (2, 4, 16, 16), dtype=jnp.float32) * 3.0

    # Default init (tau = 0.0), matching SoftAct(in_features).
    mod = SoftActPallas(in_features=4 * 16 * 16)
    y = jax.block_until_ready(mod(x))
    assert y.shape == x.shape and y.dtype == x.dtype
    assert jnp.allclose(y, _ref(x, mod.tau), atol=1e-6), "mismatch (tau=0)"

    # Nonzero positive tau (thresholding path).
    mod2 = SoftActPallas(in_features=4 * 16 * 16, tau=1.5)
    y2 = jax.block_until_ready(mod2(x))
    assert jnp.allclose(y2, _ref(x, jnp.float32(1.5)), atol=1e-6), \
        "mismatch (tau=1.5)"

    # Negative tau (learnable parameter could go negative during training).
    mod3 = SoftActPallas(in_features=4 * 16 * 16, tau=-0.5)
    y3 = jax.block_until_ready(mod3(x))
    assert jnp.allclose(y3, _ref(x, jnp.float32(-0.5)), atol=1e-6), \
        "mismatch (tau=-0.5)"

    # Ragged size (numel not a multiple of 128) exercises the padding path.
    key2 = jax.random.PRNGKey(1)
    xr = jax.random.normal(key2, (3, 5, 7), dtype=jnp.float32) * 2.0
    yr = jax.block_until_ready(soft_act(xr, jnp.float32(0.7)))
    assert yr.shape == xr.shape
    assert jnp.allclose(yr, _ref(xr, jnp.float32(0.7)), atol=1e-6), \
        "mismatch (ragged)"

    print("KERNEL_OK")
</pallas_src>

<mosaic_0001>
module attributes {stable_mosaic.version = 11 : i64} {
  func.func @_soft_kernel(%arg0: i32, %arg1: memref<1x1xf32, #tpu.memory_space<smem>>, %arg2: memref<16x128xf32, #tpu.memory_space<vmem>>, %arg3: memref<16x128xf32, #tpu.memory_space<vmem>>) attributes {dimension_semantics = [#tpu.dimension_semantics<parallel>], iteration_bounds = array<i64: 1>, scalar_prefetch = 0 : i64, scratch_operands = 0 : i64, tpu.core_type = #tpu.core_type<tc>, window_params = [{transform_indices = @transform_0, window_bounds = array<i64: 1, 1>}, {transform_indices = @transform_1, window_bounds = array<i64: 16, 128>}, {transform_indices = @transform_2, window_bounds = array<i64: 16, 128>}]} {
    %c0 = arith.constant 0 : index
    %c0_0 = arith.constant 0 : index
    %0 = memref.load %arg1[%c0, %c0_0] : memref<1x1xf32, #tpu.memory_space<smem>>
    %c0_1 = arith.constant 0 : index
    %c0_2 = arith.constant 0 : index
    %1 = vector.load %arg2[%c0_1, %c0_2] : memref<16x128xf32, #tpu.memory_space<vmem>>, vector<16x128xf32>
    %2 = vector.broadcast %0 : f32 to vector<16x128xf32>
    %3 = arith.subf %1, %2 : vector<16x128xf32>
    %cst = arith.constant 0.000000e+00 : f32
    %4 = vector.broadcast %cst : f32 to vector<16x128xf32>
    %5 = arith.maximumf %3, %4 : vector<16x128xf32>
    %cst_3 = arith.constant 0.000000e+00 : f32
    %6 = vector.broadcast %cst_3 : f32 to vector<16x128xf32>
    %7 = arith.subf %6, %1 : vector<16x128xf32>
    %8 = vector.broadcast %0 : f32 to vector<16x128xf32>
    %9 = arith.subf %7, %8 : vector<16x128xf32>
    %cst_4 = arith.constant 0.000000e+00 : f32
    %10 = vector.broadcast %cst_4 : f32 to vector<16x128xf32>
    %11 = arith.maximumf %9, %10 : vector<16x128xf32>
    %12 = arith.subf %5, %11 : vector<16x128xf32>
    %c0_5 = arith.constant 0 : index
    %c0_6 = arith.constant 0 : index
    %13 = vector.load %arg3[%c0_5, %c0_6] : memref<16x128xf32, #tpu.memory_space<vmem>>, vector<16x128xf32>
    tpu.vector_store %arg3[%c0_5, %c0_6], %12 {strides = array<i32>} : memref<16x128xf32, #tpu.memory_space<vmem>>, vector<16x128xf32>,
    return
  }
  func.func @transform_0(%arg0: i32) -> (i32, i32) {
    %c0_i32 = arith.constant 0 : i32
    %c0_i32_0 = arith.constant 0 : i32
    %c0_i32_1 = arith.constant 0 : i32
    return %c0_i32, %c0_i32_0 : i32, i32
  }
  func.func @transform_1(%arg0: i32) -> (i32, i32) {
    %c0_i32 = arith.constant 0 : i32
    %c0_i32_0 = arith.constant 0 : i32
    return %arg0, %c0_i32 : i32, i32
  }
  func.func @transform_2(%arg0: i32) -> (i32, i32) {
    %c0_i32 = arith.constant 0 : i32
    %c0_i32_0 = arith.constant 0 : i32
    return %arg0, %c0_i32 : i32, i32
  }
}

</mosaic_0001>

<bundles_post_ra>
// kernel: tpu_custom_call.1
= control target key start
LH: loop header
LB: loop body
LE: loop exit
PB: predicated region body
PF: predicated region fallthrough
CT: control target
= control target key end

     0   :  { %8 = vsyncpa [#allocation4], 0  ;;  %s166_s0 = inlined_call_operand.<no memory space> [shape: f32[1,1], index: 0, kind: input, shape index: {}]   ;;  %s167_s1 = inlined_call_operand.hbm [shape: f32[16,128], index: 1, kind: input, shape index: {}]   ;;  %s168_s2 = inlined_call_operand.hbm [shape: f32[16,128], index: 2, kind: output, shape index: {}]  }
   0x1   :  { %9 = vsyncpa [#allocation5], 0  ;;  %s114_s9 = smov [#allocation3]   ;;  %s66_s13 = scalar_lea.hbm %s167_s1, 256 }
   0x2   :  { %s17_s10 = sshll.u32 %s114_s9, 4  ;;  %p67_p0 = scmp.ne.s32.totalorder %s167_s1, %s66_s13  ;;  %s18_s10 = int_to_ptr.vmem [resolvable:$true] %s17_s10 }
   0x3   :  { %p70_p1 = scmp.lt.u32.totalorder %s66_s13, %s167_s1 }
   0x5   :  { %p72_p2 = pnand %p70_p1, %p67_p0 }
   0x7   :  { %75 = shalt.err (!%p72_p2)
}
   0x8   :  { %s76_s18 = scalar_lea.vmem %s18_s10, 256  ;;  %p81_p4 = scmp.lt.s32.totalorder %s18_s10, %s18_s10 }
   0x9   :  { %p77_p3 = scmp.ne.s32.totalorder %s18_s10, %s76_s18  ;;  %p82_p5 = scmp.lt.s32.totalorder %s76_s18, %s76_s18 }
   0xb   :  { %p83_p6 = por %p82_p5, %p81_p4 }
   0xd   :  { %p84_p7 = pnand %p83_p6, %p77_p3 }
   0xf   :  { %87 = shalt.err (!%p84_p7)
}
  0x10   :  { %s115_s19 = smov 128   ;;  %s116_s20 = smov 8  }
  0x11   :  { %23 = dma.hbm_to_vmem [thread:$0]  %s167_s1, 256, %s18_s10, [#allocation4], %s115_s19, %s115_s19, %s116_s20  }
  0x12   :  { %110 = dma.done.wait [#allocation4], 256  }
  0x13   :  { %111 = vsyncadd [#allocation4], 4294967040  ;;  %v30_v0 = vstv %s166_s0  ;;  %v28_v1 = vld [vmem:[#allocation3] sm:$0xff]  ;;  %v29_v2 = vld [vmem:[#allocation3 + $0x8] sm:$0xff]  ;;  %s117_s25 = smov [#allocation6]  }
  0x14   :  { %v31_v3 = vsub.f32 %v28_v1, %v30_v0  ;;  %v35_v4 = vsub.f32 0.0, %v28_v1  ;;  %v32_v5 = vsub.f32 %v29_v2, %v30_v0  ;;  %v36_v6 = vsub.f32 0.0, %v29_v2  ;;  %s50_s26 = sshll.u32 %s117_s25, 4  ;;  %s51_s26 = int_to_ptr.vmem [resolvable:$true] %s50_s26 }
  0x15   :  { %s88_s0 = scalar_lea.vmem %s51_s26, 256  ;;  %p93_p9 = scmp.lt.s32.totalorder %s51_s26, %s51_s26 }
  0x16   :  { %v33_v7 = vmax.f32 %v31_v3, 0.0  ;;  %v37_v8 = vsub.f32 %v35_v4, %v30_v0  ;;  %v34_v9 = vmax.f32 %v32_v5, 0.0  ;;  %v38_v10 = vsub.f32 %v36_v6, %v30_v0  ;;  %p89_p8 = scmp.ne.s32.totalorder %s51_s26, %s88_s0  ;;  %p94_p10 = scmp.lt.s32.totalorder %s88_s0, %s88_s0 }
  0x18   :  { %v39_v11 = vmax.f32 %v37_v8, 0.0  ;;  %v40_v12 = vmax.f32 %v38_v10, 0.0  ;;  %p95_p11 = por %p94_p10, %p93_p9 }
  0x1a   :  { %v41_v13 = vsub.f32 %v33_v7, %v39_v11  ;;  %v42_v14 = vsub.f32 %v34_v9, %v40_v12  ;;  %p96_p12 = pnand %p95_p11, %p89_p8 }
  0x1c   :  { %43 = vst [vmem:[#allocation6] sm:$0xff] %v41_v13  ;;  %44 = vst [vmem:[#allocation6 + $0x8] sm:$0xff] %v42_v14 }
  0x1d   :  { %99 = shalt.err (!%p96_p12)
}
  0x1e   :  { %s100_s28 = scalar_lea.hbm %s168_s2, 256 }
  0x1f   :  { %p101_p13 = scmp.ne.s32.totalorder %s168_s2, %s100_s28  ;;  %p104_p0 = scmp.lt.u32.totalorder %s100_s28, %s168_s2 }
  0x21   :  { %p106_p1 = pnand %p104_p0, %p101_p13 }
  0x23   :  { %109 = shalt.err (!%p106_p1)
}
  0x24   :  { %56 = dma.vmem_to_hbm [thread:$0]  %s51_s26, 256, %s168_s2, [#allocation5], %s115_s19, %s115_s19, %s116_s20  }
  0x25   :  { %112 = dma.done.wait [#allocation5], 256  }
  0x26   :  { %113 = vsyncadd [#allocation5], 4294967040 }
  0x27   :  { %60 = vsyncpa [#allocation4], 1 }
  0x28   :  { %61 = vsyncpa [#allocation5], 1 }

</bundles_post_ra>
